<compile_context>
chip_gen: v5e
topology: v5e:2x2
jax: 0.10.0
libtpu: 0.0.40
codegen_flags: <defaults>
</compile_context>

<pallas_src>
import jax
import jax.numpy as jnp
from jax.experimental import pallas as pl
from jax.experimental.pallas import tpu as pltpu


def _round_up(a, b):
    return ((a + b - 1) // b) * b


def _ffn_kernel(x_ref, w1_ref, b1_ref, w2_ref, b2_ref,
                gamma_ref, beta_ref, w3_ref, b3_ref, o_ref):
    """One row tile of the full block.

    Matmuls run in the weights' dtype (f32 or bf16) with f32 MXU accumulation;
    bias add, ReLU, residual and LayerNorm are done in f32.
    """
    mm_dtype = w1_ref.dtype
    x_f32 = x_ref[...].astype(jnp.float32)                    # (tm, D)

    # w_1 -> ReLU
    h = jnp.dot(x_ref[...].astype(mm_dtype), w1_ref[...],
                preferred_element_type=jnp.float32)
    h = jnp.maximum(h + b1_ref[...], 0.0)                     # (tm, H) f32

    # w_2 ; dropout == identity at eval ; residual add
    y = jnp.dot(h.astype(mm_dtype), w2_ref[...],
                preferred_element_type=jnp.float32)
    y = y + b2_ref[...] + x_f32                                # (tm, D) f32

    # LayerNorm over last axis, eps=1e-6, biased variance (torch semantics)
    mu = jnp.mean(y, axis=-1, keepdims=True)
    var = jnp.mean((y - mu) * (y - mu), axis=-1, keepdims=True)
    y_hat = (y - mu) * jax.lax.rsqrt(var + 1e-6)
    y_hat = y_hat * gamma_ref[...] + beta_ref[...]

    # w_3
    out = jnp.dot(y_hat.astype(mm_dtype), w3_ref[...],
                  preferred_element_type=jnp.float32)
    o_ref[...] = (out + b3_ref[...]).astype(o_ref.dtype)


def feed_forward(x, params, *, tm=256, matmul_dtype=None):
    """x: [B, S, D].  params: dict of (in, out)-ordered weights + biases.

    tm:            target row tile (multiple of 8).  Sweep 256/512/1024 at real
                   sizes; small inputs automatically run as one grid step.
    matmul_dtype:  optional dtype (e.g. jnp.bfloat16) for w1/w2/w3 and the
                   matmul inputs (2x MXU throughput, half weight traffic).
                   Accumulation and all non-matmul math stay f32.
    """
    B, S, D = x.shape
    M = B * S
    x2 = x.reshape(M, D)

    w1, b1 = params["w1"], params["b1"]            # (D, H), (1, H)
    w2, b2 = params["w2"], params["b2"]            # (H, D), (1, D)
    gamma, beta = params["gamma"], params["beta"]  # (1, D), (1, D)
    w3, b3 = params["w3"], params["b3"]            # (D, D), (1, D)
    H = w1.shape[1]

    if matmul_dtype is not None:
        w1 = w1.astype(matmul_dtype)
        w2 = w2.astype(matmul_dtype)
        w3 = w3.astype(matmul_dtype)
    # bias / LN params always f32 (accuracy of the elementwise / LN path)
    b1 = b1.astype(jnp.float32)
    b2 = b2.astype(jnp.float32)
    b3 = b3.astype(jnp.float32)
    gamma = gamma.astype(jnp.float32)
    beta = beta.astype(jnp.float32)

    # Effective row tile: large enough to amortize ~0.35us per-step overhead,
    # never larger than padded M -> tiny problems use grid=(1,).
    tm_eff = min(_round_up(tm, 8), _round_up(M, 8))
    Mp = _round_up(M, tm_eff)
    if Mp != M:
        x2 = jnp.pad(x2, ((0, Mp - M), (0, 0)))   # padded rows sliced off below
    grid = (Mp // tm_eff,)

    w_itemsize = jnp.dtype(w1.dtype).itemsize
    x_itemsize = jnp.dtype(x.dtype).itemsize

    # Rough VMEM estimate: double-buffered row tiles + (<=2x) resident weights
    # + live f32 intermediates.  Only raise the scoped limit when needed and
    # cap at 64 MiB so the same tm budget stays valid on v7x.
    vmem_est = (2 * 2 * tm_eff * D * x_itemsize
                + 2 * (D * H + H * D + D * D) * w_itemsize
                + 2 * (H + 3 * D) * 4
                + tm_eff * H * 4 + 6 * tm_eff * D * 4)
    vmem_limit = None
    if vmem_est > 24 * 1024 * 1024:
        vmem_limit = min(int(vmem_est * 2), 64 * 1024 * 1024)

    flops = 2 * Mp * (D * H + H * D + D * D) + 10 * Mp * D
    bytes_accessed = (2 * Mp * D * x_itemsize
                      + (D * H + H * D + D * D) * w_itemsize
                      + (H + 3 * D) * 4)
    cost = pl.CostEstimate(flops=flops, transcendentals=Mp,
                           bytes_accessed=bytes_accessed)

    row_spec = pl.BlockSpec((tm_eff, D), lambda i: (i, 0))

    def build(weight_pipeline_mode):
        def wspec(shape):
            if weight_pipeline_mode is None:
                return pl.BlockSpec(shape, lambda i: (0, 0))
            return pl.BlockSpec(shape, lambda i: (0, 0),
                                pipeline_mode=weight_pipeline_mode)
        return pl.pallas_call(
            _ffn_kernel,
            out_shape=jax.ShapeDtypeStruct((Mp, D), x.dtype),
            grid_spec=pltpu.PrefetchScalarGridSpec(
                num_scalar_prefetch=0,
                grid=grid,
                in_specs=[
                    row_spec,                                  # x rows
                    wspec((D, H)), wspec((1, H)),              # w1, b1
                    wspec((H, D)), wspec((1, D)),              # w2, b2
                    wspec((1, D)), wspec((1, D)),              # gamma, beta
                    wspec((D, D)), wspec((1, D)),              # w3, b3
                ],
                out_specs=pl.BlockSpec((tm_eff, D), lambda i: (i, 0)),
            ),
            compiler_params=pltpu.CompilerParams(
                dimension_semantics=("parallel",),
                vmem_limit_bytes=vmem_limit),
            cost_estimate=cost,
        )

    args = (x2, w1, b1, w2, b2, gamma, beta, w3, b3)
    try:
        # Weights / biases / LN params have a constant index_map: single-buffer
        # them so they don't pay the default double-buffer VMEM cost.
        out2 = build(pl.Buffered(1))(*args)
    except Exception:
        # Fallback for Pallas builds without per-BlockSpec pipeline_mode.
        out2 = build(None)(*args)

    return out2[:M].reshape(B, S, D)


def init_params(key, d_model, d_inner, dtype=jnp.float32):
    """Deterministic synthetic parameters (shapes match the torch module)."""
    ks = jax.random.split(key, 6)
    scale1 = 1.0 / jnp.sqrt(d_model)
    scale2 = 1.0 / jnp.sqrt(d_inner)
    return {
        # stored as (in_features, out_features) == torch weight transposed
        "w1": (jax.random.normal(ks[0], (d_model, d_inner), dtype) * scale1),
        "b1": (jax.random.normal(ks[1], (1, d_inner), dtype) * scale1),
        "w2": (jax.random.normal(ks[2], (d_inner, d_model), dtype) * scale2),
        "b2": (jax.random.normal(ks[3], (1, d_model), dtype) * scale2),
        "gamma": jnp.ones((1, d_model), dtype),
        "beta": jnp.zeros((1, d_model), dtype),
        "w3": (jax.random.normal(ks[4], (d_model, d_model), dtype) * scale1),
        "b3": (jax.random.normal(ks[5], (1, d_model), dtype) * scale1),
    }


def _reference(x, p):
    """Pure-JAX reference of the torch forward (eval mode)."""
    y = jnp.maximum(x @ p["w1"] + p["b1"], 0.0) @ p["w2"] + p["b2"]
    y = y + x
    mu = jnp.mean(y, axis=-1, keepdims=True)
    var = jnp.mean((y - mu) ** 2, axis=-1, keepdims=True)
    y = (y - mu) / jnp.sqrt(var + 1e-6) * p["gamma"] + p["beta"]
    return y @ p["w3"] + p["b3"]


if __name__ == "__main__":
    # enc block: d_model_sp=16, d_model_traj=16 -> D=32; d_inner=64
    B, S = 2, 8
    d_model_sp, d_model_traj, d_inner = 16, 16, 64
    D = d_model_sp + d_model_traj

    key = jax.random.PRNGKey(0)
    kx, kp = jax.random.split(key)
    x = jax.random.normal(kx, (B, S, D), jnp.float32)
    params = init_params(kp, D, d_inner)

    ref = _reference(x, params)

    # f32 path: exact torch semantics (single grid step at this tiny size).
    out = jax.block_until_ready(feed_forward(x, params))
    assert out.shape == (B, S, D)
    assert jnp.allclose(out, ref, atol=1e-4, rtol=1e-4), "mismatch vs reference"

    # bf16-weight path: 2x MXU throughput / half the weight traffic; LN and
    # accumulation stay f32 so only a small tolerance relaxation is needed.
    out_bf16 = jax.block_until_ready(
        feed_forward(x, params, matmul_dtype=jnp.bfloat16))
    assert out_bf16.shape == (B, S, D)
    assert jnp.allclose(out_bf16, ref, atol=5e-2, rtol=5e-2), "bf16 mismatch"

    # TODO(synk): dropout is implemented as identity (eval mode); training-mode
    # stochastic dropout would use pltpu.prng_seed / pltpu.stateful_bernoulli.
    print("KERNEL_OK")
</pallas_src>

<mosaic_0001>
module attributes {stable_mosaic.version = 11 : i64} {
  func.func @_ffn_kernel(%arg0: i32, %arg1: memref<16x32xf32, #tpu.memory_space<vmem>>, %arg2: memref<32x64xf32, #tpu.memory_space<vmem>>, %arg3: memref<1x64xf32, #tpu.memory_space<vmem>>, %arg4: memref<64x32xf32, #tpu.memory_space<vmem>>, %arg5: memref<1x32xf32, #tpu.memory_space<vmem>>, %arg6: memref<1x32xf32, #tpu.memory_space<vmem>>, %arg7: memref<1x32xf32, #tpu.memory_space<vmem>>, %arg8: memref<32x32xf32, #tpu.memory_space<vmem>>, %arg9: memref<1x32xf32, #tpu.memory_space<vmem>>, %arg10: memref<16x32xf32, #tpu.memory_space<vmem>>) attributes {dimension_semantics = [#tpu.dimension_semantics<parallel>], iteration_bounds = array<i64: 1>, scalar_prefetch = 0 : i64, scratch_operands = 0 : i64, tpu.core_type = #tpu.core_type<tc>, window_params = [{transform_indices = @transform_0, window_bounds = array<i64: 16, 32>}, {pipeline_mode = #tpu.pipeline_mode<synchronous>, transform_indices = @transform_1, window_bounds = array<i64: 32, 64>}, {pipeline_mode = #tpu.pipeline_mode<synchronous>, transform_indices = @transform_2, window_bounds = array<i64: 1, 64>}, {pipeline_mode = #tpu.pipeline_mode<synchronous>, transform_indices = @transform_3, window_bounds = array<i64: 64, 32>}, {pipeline_mode = #tpu.pipeline_mode<synchronous>, transform_indices = @transform_4, window_bounds = array<i64: 1, 32>}, {pipeline_mode = #tpu.pipeline_mode<synchronous>, transform_indices = @transform_5, window_bounds = array<i64: 1, 32>}, {pipeline_mode = #tpu.pipeline_mode<synchronous>, transform_indices = @transform_6, window_bounds = array<i64: 1, 32>}, {pipeline_mode = #tpu.pipeline_mode<synchronous>, transform_indices = @transform_7, window_bounds = array<i64: 32, 32>}, {pipeline_mode = #tpu.pipeline_mode<synchronous>, transform_indices = @transform_8, window_bounds = array<i64: 1, 32>}, {transform_indices = @transform_9, window_bounds = array<i64: 16, 32>}]} {
    %c0 = arith.constant 0 : index
    %c0_0 = arith.constant 0 : index
    %0 = vector.load %arg1[%c0, %c0_0] : memref<16x32xf32, #tpu.memory_space<vmem>>, vector<16x32xf32>
    %c0_1 = arith.constant 0 : index
    %c0_2 = arith.constant 0 : index
    %1 = vector.load %arg1[%c0_1, %c0_2] : memref<16x32xf32, #tpu.memory_space<vmem>>, vector<16x32xf32>
    %c0_3 = arith.constant 0 : index
    %c0_4 = arith.constant 0 : index
    %2 = vector.load %arg2[%c0_3, %c0_4] : memref<32x64xf32, #tpu.memory_space<vmem>>, vector<32x64xf32>
    %cst = arith.constant dense<0.000000e+00> : vector<16x64xf32>
    %3 = tpu.matmul %1, %2, %cst {dimension_numbers = #tpu.dot_dimension_numbers<[1], [0], [0], [1], [0, 0, 1, 1], [], []>} : vector<16x32xf32>, vector<32x64xf32>, vector<16x64xf32> -> vector<16x64xf32>
    %c0_5 = arith.constant 0 : index
    %c0_6 = arith.constant 0 : index
    %4 = vector.load %arg3[%c0_5, %c0_6] : memref<1x64xf32, #tpu.memory_space<vmem>>, vector<1x64xf32>
    %5 = vector.broadcast %4 : vector<1x64xf32> to vector<16x64xf32>
    %6 = arith.addf %3, %5 : vector<16x64xf32>
    %cst_7 = arith.constant 0.000000e+00 : f32
    %7 = vector.broadcast %cst_7 : f32 to vector<16x64xf32>
    %8 = arith.maximumf %6, %7 : vector<16x64xf32>
    %c0_8 = arith.constant 0 : index
    %c0_9 = arith.constant 0 : index
    %9 = vector.load %arg4[%c0_8, %c0_9] : memref<64x32xf32, #tpu.memory_space<vmem>>, vector<64x32xf32>
    %cst_10 = arith.constant dense<0.000000e+00> : vector<16x32xf32>
    %10 = tpu.matmul %8, %9, %cst_10 {dimension_numbers = #tpu.dot_dimension_numbers<[1], [0], [0], [1], [0, 0, 1, 1], [], []>} : vector<16x64xf32>, vector<64x32xf32>, vector<16x32xf32> -> vector<16x32xf32>
    %c0_11 = arith.constant 0 : index
    %c0_12 = arith.constant 0 : index
    %11 = vector.load %arg5[%c0_11, %c0_12] : memref<1x32xf32, #tpu.memory_space<vmem>>, vector<1x32xf32>
    %12 = vector.broadcast %11 : vector<1x32xf32> to vector<16x32xf32>
    %13 = arith.addf %10, %12 : vector<16x32xf32>
    %14 = arith.addf %13, %0 : vector<16x32xf32>
    %cst_13 = arith.constant dense<0.000000e+00> : vector<16xf32>
    %15 = vector.multi_reduction <add>, %14, %cst_13 [1] : vector<16x32xf32> to vector<16xf32>
    %16 = vector.shape_cast %15 : vector<16xf32> to vector<16x1xf32>
    %cst_14 = arith.constant 3.200000e+01 : f32
    %17 = vector.broadcast %cst_14 : f32 to vector<16x1xf32>
    %18 = arith.divf %16, %17 : vector<16x1xf32>
    %19 = vector.broadcast %18 : vector<16x1xf32> to vector<16x32xf32>
    %20 = arith.subf %14, %19 : vector<16x32xf32>
    %21 = vector.broadcast %18 : vector<16x1xf32> to vector<16x32xf32>
    %22 = arith.subf %14, %21 : vector<16x32xf32>
    %23 = arith.mulf %20, %22 : vector<16x32xf32>
    %cst_15 = arith.constant dense<0.000000e+00> : vector<16xf32>
    %24 = vector.multi_reduction <add>, %23, %cst_15 [1] : vector<16x32xf32> to vector<16xf32>
    %25 = vector.shape_cast %24 : vector<16xf32> to vector<16x1xf32>
    %cst_16 = arith.constant 3.200000e+01 : f32
    %26 = vector.broadcast %cst_16 : f32 to vector<16x1xf32>
    %27 = arith.divf %25, %26 : vector<16x1xf32>
    %28 = vector.broadcast %18 : vector<16x1xf32> to vector<16x32xf32>
    %29 = arith.subf %14, %28 : vector<16x32xf32>
    %cst_17 = arith.constant 9.99999997E-7 : f32
    %30 = vector.broadcast %cst_17 : f32 to vector<16x1xf32>
    %31 = arith.addf %27, %30 : vector<16x1xf32>
    %32 = math.rsqrt %31 : vector<16x1xf32>
    %33 = vector.broadcast %32 : vector<16x1xf32> to vector<16x32xf32>
    %34 = arith.mulf %29, %33 : vector<16x32xf32>
    %c0_18 = arith.constant 0 : index
    %c0_19 = arith.constant 0 : index
    %35 = vector.load %arg6[%c0_18, %c0_19] : memref<1x32xf32, #tpu.memory_space<vmem>>, vector<1x32xf32>
    %36 = vector.broadcast %35 : vector<1x32xf32> to vector<16x32xf32>
    %37 = arith.mulf %34, %36 : vector<16x32xf32>
    %c0_20 = arith.constant 0 : index
    %c0_21 = arith.constant 0 : index
    %38 = vector.load %arg7[%c0_20, %c0_21] : memref<1x32xf32, #tpu.memory_space<vmem>>, vector<1x32xf32>
    %39 = vector.broadcast %38 : vector<1x32xf32> to vector<16x32xf32>
    %40 = arith.addf %37, %39 : vector<16x32xf32>
    %c0_22 = arith.constant 0 : index
    %c0_23 = arith.constant 0 : index
    %41 = vector.load %arg8[%c0_22, %c0_23] : memref<32x32xf32, #tpu.memory_space<vmem>>, vector<32x32xf32>
    %cst_24 = arith.constant dense<0.000000e+00> : vector<16x32xf32>
    %42 = tpu.matmul %40, %41, %cst_24 {dimension_numbers = #tpu.dot_dimension_numbers<[1], [0], [0], [1], [0, 0, 1, 1], [], []>} : vector<16x32xf32>, vector<32x32xf32>, vector<16x32xf32> -> vector<16x32xf32>
    %c0_25 = arith.constant 0 : index
    %c0_26 = arith.constant 0 : index
    %43 = vector.load %arg9[%c0_25, %c0_26] : memref<1x32xf32, #tpu.memory_space<vmem>>, vector<1x32xf32>
    %44 = vector.broadcast %43 : vector<1x32xf32> to vector<16x32xf32>
    %45 = arith.addf %42, %44 : vector<16x32xf32>
    %c0_27 = arith.constant 0 : index
    %c0_28 = arith.constant 0 : index
    %46 = vector.load %arg10[%c0_27, %c0_28] : memref<16x32xf32, #tpu.memory_space<vmem>>, vector<16x32xf32>
    tpu.vector_store %arg10[%c0_27, %c0_28], %45 {strides = array<i32>} : memref<16x32xf32, #tpu.memory_space<vmem>>, vector<16x32xf32>,
    return
  }
  func.func @transform_0(%arg0: i32) -> (i32, i32) {
    %c0_i32 = arith.constant 0 : i32
    %c0_i32_0 = arith.constant 0 : i32
    return %arg0, %c0_i32 : i32, i32
  }
  func.func @transform_1(%arg0: i32) -> (i32, i32) {
    %c0_i32 = arith.constant 0 : i32
    %c0_i32_0 = arith.constant 0 : i32
    %c0_i32_1 = arith.constant 0 : i32
    return %c0_i32, %c0_i32_0 : i32, i32
  }
  func.func @transform_2(%arg0: i32) -> (i32, i32) {
    %c0_i32 = arith.constant 0 : i32
    %c0_i32_0 = arith.constant 0 : i32
    %c0_i32_1 = arith.constant 0 : i32
    return %c0_i32, %c0_i32_0 : i32, i32
  }
  func.func @transform_3(%arg0: i32) -> (i32, i32) {
    %c0_i32 = arith.constant 0 : i32
    %c0_i32_0 = arith.constant 0 : i32
    %c0_i32_1 = arith.constant 0 : i32
    return %c0_i32, %c0_i32_0 : i32, i32
  }
  func.func @transform_4(%arg0: i32) -> (i32, i32) {
    %c0_i32 = arith.constant 0 : i32
    %c0_i32_0 = arith.constant 0 : i32
    %c0_i32_1 = arith.constant 0 : i32
    return %c0_i32, %c0_i32_0 : i32, i32
  }
  func.func @transform_5(%arg0: i32) -> (i32, i32) {
    %c0_i32 = arith.constant 0 : i32
    %c0_i32_0 = arith.constant 0 : i32
    %c0_i32_1 = arith.constant 0 : i32
    return %c0_i32, %c0_i32_0 : i32, i32
  }
  func.func @transform_6(%arg0: i32) -> (i32, i32) {
    %c0_i32 = arith.constant 0 : i32
    %c0_i32_0 = arith.constant 0 : i32
    %c0_i32_1 = arith.constant 0 : i32
    return %c0_i32, %c0_i32_0 : i32, i32
  }
  func.func @transform_7(%arg0: i32) -> (i32, i32) {
    %c0_i32 = arith.constant 0 : i32
    %c0_i32_0 = arith.constant 0 : i32
    %c0_i32_1 = arith.constant 0 : i32
    return %c0_i32, %c0_i32_0 : i32, i32
  }
  func.func @transform_8(%arg0: i32) -> (i32, i32) {
    %c0_i32 = arith.constant 0 : i32
    %c0_i32_0 = arith.constant 0 : i32
    %c0_i32_1 = arith.constant 0 : i32
    return %c0_i32, %c0_i32_0 : i32, i32
  }
  func.func @transform_9(%arg0: i32) -> (i32, i32) {
    %c0_i32 = arith.constant 0 : i32
    %c0_i32_0 = arith.constant 0 : i32
    return %arg0, %c0_i32 : i32, i32
  }
}

module attributes {stable_mosaic.version = 11 : i64} {
  func.func @_ffn_kernel(%arg0: i32, %arg1: memref<16x32xf32, #tpu.memory_space<vmem>>, %arg2: memref<32x64xf32, #tpu.memory_space<vmem>>, %arg3: memref<1x64xf32, #tpu.memory_space<vmem>>, %arg4: memref<64x32xf32, #tpu.memory_space<vmem>>, %arg5: memref<1x32xf32, #tpu.memory_space<vmem>>, %arg6: memref<1x32xf32, #tpu.memory_space<vmem>>, %arg7: memref<1x32xf32, #tpu.memory_space<vmem>>, %arg8: memref<32x32xf32, #tpu.memory_space<vmem>>, %arg9: memref<1x32xf32, #tpu.memory_space<vmem>>, %arg10: memref<16x32xf32, #tpu.memory_space<vmem>>) attributes {dimension_semantics = [#tpu.dimension_semantics<parallel>], iteration_bounds = array<i64: 1>, scalar_prefetch = 0 : i64, scratch_operands = 0 : i64, tpu.core_type = #tpu.core_type<tc>, window_params = [{transform_indices = @transform_0, window_bounds = array<i64: 16, 32>}, {pipeline_mode = #tpu.pipeline_mode<synchronous>, transform_indices = @transform_1, window_bounds = array<i64: 32, 64>}, {pipeline_mode = #tpu.pipeline_mode<synchronous>, transform_indices = @transform_2, window_bounds = array<i64: 1, 64>}, {pipeline_mode = #tpu.pipeline_mode<synchronous>, transform_indices = @transform_3, window_bounds = array<i64: 64, 32>}, {pipeline_mode = #tpu.pipeline_mode<synchronous>, transform_indices = @transform_4, window_bounds = array<i64: 1, 32>}, {pipeline_mode = #tpu.pipeline_mode<synchronous>, transform_indices = @transform_5, window_bounds = array<i64: 1, 32>}, {pipeline_mode = #tpu.pipeline_mode<synchronous>, transform_indices = @transform_6, window_bounds = array<i64: 1, 32>}, {pipeline_mode = #tpu.pipeline_mode<synchronous>, transform_indices = @transform_7, window_bounds = array<i64: 32, 32>}, {pipeline_mode = #tpu.pipeline_mode<synchronous>, transform_indices = @transform_8, window_bounds = array<i64: 1, 32>}, {transform_indices = @transform_9, window_bounds = array<i64: 16, 32>}]} {
    %c0 = arith.constant 0 : index
    %c0_0 = arith.constant 0 : index
    %0 = vector.load %arg1[%c0, %c0_0] : memref<16x32xf32, #tpu.memory_space<vmem>>, vector<16x32xf32>
    %c0_1 = arith.constant 0 : index
    %c0_2 = arith.constant 0 : index
    %1 = vector.load %arg1[%c0_1, %c0_2] : memref<16x32xf32, #tpu.memory_space<vmem>>, vector<16x32xf32>
    %c0_3 = arith.constant 0 : index
    %c0_4 = arith.constant 0 : index
    %2 = vector.load %arg2[%c0_3, %c0_4] : memref<32x64xf32, #tpu.memory_space<vmem>>, vector<32x64xf32>
    %cst = arith.constant dense<0.000000e+00> : vector<16x64xf32>
    %3 = tpu.matmul %1, %2, %cst {dimension_numbers = #tpu.dot_dimension_numbers<[1], [0], [0], [1], [0, 0, 1, 1], [], []>} : vector<16x32xf32>, vector<32x64xf32>, vector<16x64xf32> -> vector<16x64xf32>
    %c0_5 = arith.constant 0 : index
    %c0_6 = arith.constant 0 : index
    %4 = vector.load %arg3[%c0_5, %c0_6] : memref<1x64xf32, #tpu.memory_space<vmem>>, vector<1x64xf32>
    %5 = vector.broadcast %4 : vector<1x64xf32> to vector<16x64xf32>
    %6 = arith.addf %3, %5 : vector<16x64xf32>
    %cst_7 = arith.constant 0.000000e+00 : f32
    %7 = vector.broadcast %cst_7 : f32 to vector<16x64xf32>
    %8 = arith.maximumf %6, %7 : vector<16x64xf32>
    %c0_8 = arith.constant 0 : index
    %c0_9 = arith.constant 0 : index
    %9 = vector.load %arg4[%c0_8, %c0_9] : memref<64x32xf32, #tpu.memory_space<vmem>>, vector<64x32xf32>
    %cst_10 = arith.constant dense<0.000000e+00> : vector<16x32xf32>
    %10 = tpu.matmul %8, %9, %cst_10 {dimension_numbers = #tpu.dot_dimension_numbers<[1], [0], [0], [1], [0, 0, 1, 1], [], []>} : vector<16x64xf32>, vector<64x32xf32>, vector<16x32xf32> -> vector<16x32xf32>
    %c0_11 = arith.constant 0 : index
    %c0_12 = arith.constant 0 : index
    %11 = vector.load %arg5[%c0_11, %c0_12] : memref<1x32xf32, #tpu.memory_space<vmem>>, vector<1x32xf32>
    %12 = vector.broadcast %11 : vector<1x32xf32> to vector<16x32xf32>
    %13 = arith.addf %10, %12 : vector<16x32xf32>
    %14 = arith.addf %13, %0 : vector<16x32xf32>
    %cst_13 = arith.constant dense<0.000000e+00> : vector<16xf32>
    %15 = vector.multi_reduction <add>, %14, %cst_13 [1] : vector<16x32xf32> to vector<16xf32>
    %16 = vector.shape_cast %15 : vector<16xf32> to vector<16x1xf32>
    %cst_14 = arith.constant 3.200000e+01 : f32
    %17 = vector.broadcast %cst_14 : f32 to vector<16x1xf32>
    %18 = arith.divf %16, %17 : vector<16x1xf32>
    %19 = vector.broadcast %18 : vector<16x1xf32> to vector<16x32xf32>
    %20 = arith.subf %14, %19 : vector<16x32xf32>
    %21 = vector.broadcast %18 : vector<16x1xf32> to vector<16x32xf32>
    %22 = arith.subf %14, %21 : vector<16x32xf32>
    %23 = arith.mulf %20, %22 : vector<16x32xf32>
    %cst_15 = arith.constant dense<0.000000e+00> : vector<16xf32>
    %24 = vector.multi_reduction <add>, %23, %cst_15 [1] : vector<16x32xf32> to vector<16xf32>
    %25 = vector.shape_cast %24 : vector<16xf32> to vector<16x1xf32>
    %cst_16 = arith.constant 3.200000e+01 : f32
    %26 = vector.broadcast %cst_16 : f32 to vector<16x1xf32>
    %27 = arith.divf %25, %26 : vector<16x1xf32>
    %28 = vector.broadcast %18 : vector<16x1xf32> to vector<16x32xf32>
    %29 = arith.subf %14, %28 : vector<16x32xf32>
    %cst_17 = arith.constant 9.99999997E-7 : f32
    %30 = vector.broadcast %cst_17 : f32 to vector<16x1xf32>
    %31 = arith.addf %27, %30 : vector<16x1xf32>
    %32 = math.rsqrt %31 : vector<16x1xf32>
    %33 = vector.broadcast %32 : vector<16x1xf32> to vector<16x32xf32>
    %34 = arith.mulf %29, %33 : vector<16x32xf32>
    %c0_18 = arith.constant 0 : index
    %c0_19 = arith.constant 0 : index
    %35 = vector.load %arg6[%c0_18, %c0_19] : memref<1x32xf32, #tpu.memory_space<vmem>>, vector<1x32xf32>
    %36 = vector.broadcast %35 : vector<1x32xf32> to vector<16x32xf32>
    %37 = arith.mulf %34, %36 : vector<16x32xf32>
    %c0_20 = arith.constant 0 : index
    %c0_21 = arith.constant 0 : index
    %38 = vector.load %arg7[%c0_20, %c0_21] : memref<1x32xf32, #tpu.memory_space<vmem>>, vector<1x32xf32>
    %39 = vector.broadcast %38 : vector<1x32xf32> to vector<16x32xf32>
    %40 = arith.addf %37, %39 : vector<16x32xf32>
    %c0_22 = arith.constant 0 : index
    %c0_23 = arith.constant 0 : index
    %41 = vector.load %arg8[%c0_22, %c0_23] : memref<32x32xf32, #tpu.memory_space<vmem>>, vector<32x32xf32>
    %cst_24 = arith.constant dense<0.000000e+00> : vector<16x32xf32>
    %42 = tpu.matmul %40, %41, %cst_24 {dimension_numbers = #tpu.dot_dimension_numbers<[1], [0], [0], [1], [0, 0, 1, 1], [], []>} : vector<16x32xf32>, vector<32x32xf32>, vector<16x32xf32> -> vector<16x32xf32>
    %c0_25 = arith.constant 0 : index
    %c0_26 = arith.constant 0 : index
    %43 = vector.load %arg9[%c0_25, %c0_26] : memref<1x32xf32, #tpu.memory_space<vmem>>, vector<1x32xf32>
    %44 = vector.broadcast %43 : vector<1x32xf32> to vector<16x32xf32>
    %45 = arith.addf %42, %44 : vector<16x32xf32>
    %c0_27 = arith.constant 0 : index
    %c0_28 = arith.constant 0 : index
    %46 = vector.load %arg10[%c0_27, %c0_28] : memref<16x32xf32, #tpu.memory_space<vmem>>, vector<16x32xf32>
    tpu.vector_store %arg10[%c0_27, %c0_28], %45 {strides = array<i32>} : memref<16x32xf32, #tpu.memory_space<vmem>>, vector<16x32xf32>,
    return
  }
  func.func @transform_0(%arg0: i32) -> (i32, i32) {
    %c0_i32 = arith.constant 0 : i32
    %c0_i32_0 = arith.constant 0 : i32
    return %arg0, %c0_i32 : i32, i32
  }
  func.func @transform_1(%arg0: i32) -> (i32, i32) {
    %c0_i32 = arith.constant 0 : i32
    %c0_i32_0 = arith.constant 0 : i32
    %c0_i32_1 = arith.constant 0 : i32
    return %c0_i32, %c0_i32_0 : i32, i32
  }
  func.func @transform_2(%arg0: i32) -> (i32, i32) {
    %c0_i32 = arith.constant 0 : i32
    %c0_i32_0 = arith.constant 0 : i32
    %c0_i32_1 = arith.constant 0 : i32
    return %c0_i32, %c0_i32_0 : i32, i32
  }
  func.func @transform_3(%arg0: i32) -> (i32, i32) {
    %c0_i32 = arith.constant 0 : i32
    %c0_i32_0 = arith.constant 0 : i32
    %c0_i32_1 = arith.constant 0 : i32
    return %c0_i32, %c0_i32_0 : i32, i32
  }
  func.func @transform_4(%arg0: i32) -> (i32, i32) {
    %c0_i32 = arith.constant 0 : i32
    %c0_i32_0 = arith.constant 0 : i32
    %c0_i32_1 = arith.constant 0 : i32
    return %c0_i32, %c0_i32_0 : i32, i32
  }
  func.func @transform_5(%arg0: i32) -> (i32, i32) {
    %c0_i32 = arith.constant 0 : i32
    %c0_i32_0 = arith.constant 0 : i32
    %c0_i32_1 = arith.constant 0 : i32
    return %c0_i32, %c0_i32_0 : i32, i32
  }
  func.func @transform_6(%arg0: i32) -> (i32, i32) {
    %c0_i32 = arith.constant 0 : i32
    %c0_i32_0 = arith.constant 0 : i32
    %c0_i32_1 = arith.constant 0 : i32
    return %c0_i32, %c0_i32_0 : i32, i32
  }
  func.func @transform_7(%arg0: i32) -> (i32, i32) {
    %c0_i32 = arith.constant 0 : i32
    %c0_i32_0 = arith.constant 0 : i32
    %c0_i32_1 = arith.constant 0 : i32
    return %c0_i32, %c0_i32_0 : i32, i32
  }
  func.func @transform_8(%arg0: i32) -> (i32, i32) {
    %c0_i32 = arith.constant 0 : i32
    %c0_i32_0 = arith.constant 0 : i32
    %c0_i32_1 = arith.constant 0 : i32
    return %c0_i32, %c0_i32_0 : i32, i32
  }
  func.func @transform_9(%arg0: i32) -> (i32, i32) {
    %c0_i32 = arith.constant 0 : i32
    %c0_i32_0 = arith.constant 0 : i32
    return %arg0, %c0_i32 : i32, i32
  }
}

</mosaic_0001>

<bundles_post_ra>
// kernel: tpu_custom_call.1
= control target key start
LH: loop header
LB: loop body
LE: loop exit
PB: predicated region body
PF: predicated region fallthrough
CT: control target
= control target key end

     0   :  { %vm43_vm0 = vcmask 261120   ;;  %s430_s0 = inlined_call_operand.vmem [shape: f32[16,32], index: 0, kind: input, shape index: {}]   ;;  %s431_s1 = inlined_call_operand.vmem [shape: f32[32,64], index: 1, kind: input, shape index: {}]   ;;  %s432_s2 = inlined_call_operand.vmem [shape: f32[1,64], index: 2, kind: input, shape index: {}]   ;;  %s433_s3 = inlined_call_operand.vmem [shape: f32[64,32], index: 3, kind: input, shape index: {}]   ;;  %s434_s4 = inlined_call_operand.vmem [shape: f32[1,32], index: 4, kind: input, shape index: {}]   ;;  %s435_s5 = inlined_call_operand.vmem [shape: f32[1,32], index: 5, kind: input, shape index: {}]   ;;  %s436_s6 = inlined_call_operand.vmem [shape: f32[1,32], index: 6, kind: input, shape index: {}]   ;;  %s437_s7 = inlined_call_operand.vmem [shape: f32[32,32], index: 7, kind: input, shape index: {}]   ;;  %s438_s8 = inlined_call_operand.vmem [shape: f32[1,32], index: 8, kind: input, shape index: {}]   ;;  %s439_s9 = inlined_call_operand.hbm [shape: f32[16,32], index: 9, kind: output, shape index: {}]  }
   0x1   :  { %v38_v0 = vld [vmem:[%s431_s1 + $0x18] sm:$0xff]  ;;  %v37_v1 = vld [vmem:[%s431_s1 + $0x10] sm:$0xff]  ;;  %v36_v2 = vld [vmem:[%s431_s1 + $0x8] sm:$0xff] }
   0x2   :  { %62 = vmatpush.msra.mxu0 %v38_v0  ;;  %v82_v3 = vld [vmem:[%s433_s3 + $0x38] sm:$0xff]  ;;  %v81_v4 = vld [vmem:[%s433_s3 + $0x30] sm:$0xff]  ;;  %v35_v5 = vld [vmem:[%s431_s1] sm:$0xff] }
   0x3   :  { %v33_v6 = vld [vmem:[%s430_s0] sm:$0xff]  ;;  %102 = vmatpush.msra.mxu1 %v82_v3  ;;  %v80_v7 = vld [vmem:[%s433_s3 + $0x28] sm:$0xff]  ;;  %245 = vmatpush.msra.mxu3 %v82_v3 }
   0x4   :  { %63 = vmatpush.msra.mxu0 %v37_v1 }
   0x5   :  { %103 = vmatpush.msra.mxu1 %v81_v4 }
   0x6   :  { %64 = vmatpush.msra.mxu0 %v36_v2 }
   0x7   :  { %14 = vsyncpa [#allocation3], 0  ;;  %v79_v8 = vld [vmem:[%s433_s3 + $0x20] sm:$0xff]  ;;  %246 = vmatpush.msra.mxu3 %v81_v4  ;;  %104 = vmatpush.msra.mxu1 %v80_v7  ;;  %v78_v9 = vld [vmem:[%s433_s3 + $0x18] sm:$0xff]  ;;  %vm87_vm1 = vcmask 523264   ;;  %v294_v30 = vmov 32.0  }
   0x8   :  { %65 = vmatpush.msra.mxu0 %v35_v5  ;;  %v34_v10 = vld [vmem:[%s430_s0 + $0x8] sm:$0xff]  ;;  %v77_v11 = vld [vmem:[%s433_s3 + $0x10] sm:$0xff]  ;;  %v75_v13 = vld [vmem:[%s433_s3] sm:$0xff]  ;;  %262 = vrcp.f32 %v294_v30  ;;  %s295_s26 = smov [#allocation2]   ;;  %s227_s29 = sshll.u32 %s439_s9, 4  ;;  %s228_s29 = int_to_ptr.hbm [resolvable:$true] %s227_s29 }
   0x9   :  { %239 = vmatmul.msk.f32.vlgmr.msra.gmra.mxu0 %vm43_vm0, %v33_v6  ;;  %247 = vmatpush.msra.mxu3 %v80_v7  ;;  %v76_v12 = vld [vmem:[%s433_s3 + $0x8] sm:$0xff]  ;;  %v257_v14 = vld [vmem:[%s432_s2] ss:$0 sm:$0xff]  ;;  %v185_v47 = vld [vmem:[%s437_s7 + $0x18] sm:$0xff]  ;;  %s225_s1 = sshll.u32 %s295_s26, 4  ;;  %s296_s30 = smov 128   ;;  %s226_s1 = int_to_ptr.vmem [resolvable:$true] %s225_s1 }
   0xa   :  { %105 = vmatpush.msra.mxu1 %v79_v8  ;;  %v258_v21 = vld [vmem:[%s434_s4] ss:$0 sm:$0xff]  ;;  %208 = vmatpush.msra.mxu2 %v185_v47  ;;  %v184_v48 = vld [vmem:[%s437_s7 + $0x10] sm:$0xff]  ;;  %v183_v49 = vld [vmem:[%s437_s7 + $0x8] sm:$0xff]  ;;  %s297_s10 = smov 8  }
   0xb   :  { %248 = vmatpush.msra.mxu3 %v79_v8  ;;  %v182_v50 = vld [vmem:[%s437_s7] sm:$0xff] }
   0xc   :  { %106 = vmatpush.msra.mxu1 %v78_v9  ;;  %209 = vmatpush.msra.mxu2 %v184_v48  ;;  %v259_v63 = vld [vmem:[%s435_s5] ss:$0 sm:$0xff] }
   0xd   :  { %249 = vmatpush.msra.mxu3 %v78_v9  ;;  %v260_v2 = vld [vmem:[%s436_s6] ss:$0 sm:$0xff] }
   0xe   :  { %107 = vmatpush.msra.mxu1 %v77_v11  ;;  %v263_v31 = vpop.eup %262  ;;  %210 = vmatpush.msra.mxu2 %v183_v49 }
   0xf   :  { %250 = vmatpush.msra.mxu3 %v77_v11  ;;  %v126_v32 = vmul.f32 32.0, %v263_v31  ;;  %vm130_vm2 = vweird.f32 %v263_v31 }
  0x10   :  { %108 = vmatpush.msra.mxu1 %v76_v12  ;;  %211 = vmatpush.msra.mxu2 %v182_v50 }
  0x11   :  { %240 = vmatmul.msk.f32.gmra.mxu0 %vm43_vm0, %v34_v10  ;;  %251 = vmatpush.msra.mxu3 %v76_v12  ;;  %v127_v33 = vsub.f32 1.0, %v126_v32 }
  0x12   :  { %109 = vmatpush.msra.mxu1 %v75_v13 }
  0x13   :  { %252 = vmatpush.msra.mxu3 %v75_v13  ;;  %v128_v34 = vmul.f32 %v263_v31, %v127_v33 }
  0x15   :  { %v129_v35 = vadd.f32 %v263_v31, %v128_v34 }
  0x17   :  { %v131_v36 = vsel %vm130_vm2, %v263_v31, %v129_v35 }
  0x86   :  { %v67_v15 = vpop.f32.mrf.mxu0 }
  0x87   :  { %v68_v16 = vadd.f32 %v257_v14, %v67_v15  ;;  %v261_v15 = vld [vmem:[%s438_s8] ss:$0 sm:$0xff] }
  0x89   :  { %v73_v17 = vmax.f32 %v68_v16, 0.0 }
  0x8b   :  { %241 = vmatmul.msk.f32.vlgmr.msra.gmra.mxu1 %vm87_vm1, %v73_v17 }
  0x8e   :  { %v70_v18 = vpop.f32.mrf.mxu0 }
  0x8f   :  { %v71_v19 = vadd.f32 %v257_v14, %v70_v18 }
  0x91   :  { %v74_v20 = vmax.f32 %v71_v19, 0.0 }
  0x93   :  { %242 = vmatmul.msk.f32.vlgmr.msra.gmra.mxu3 %vm87_vm1, %v74_v20 }
 0x108   :  { %v111_v22 = vpop.f32.mrf.mxu1 }
 0x109   :  { %v112_v23 = vadd.f32 %v258_v21, %v111_v22 }
 0x10b   :  { %v117_v24 = vadd.f32 %v112_v23, %v33_v6 }
 0x10d   :  { %v119_v25 = vsel %vm43_vm0, %v117_v24, 0.0 }
 0x10e   :  { %120 = vadd.xlane.f32.xlu0 %v119_v25 }
 0x116   :  { %v114_v26 = vpop.f32.mrf.mxu3 }
 0x117   :  { %v115_v27 = vadd.f32 %v258_v21, %v114_v26 }
 0x119   :  { %v118_v28 = vadd.f32 %v115_v27, %v34_v10 }
 0x11b   :  { %v122_v29 = vsel %vm43_vm0, %v118_v28, 0.0 }
 0x11c   :  { %123 = vadd.xlane.f32.xlu0 %v122_v29 }
 0x181   :  { %v121_v37 = vpop.xlane.xlu0 %120 }
 0x182   :  { %v132_v38 = vmul.f32 %v131_v36, %v121_v37 }
 0x184   :  { %v134_v39 = vsub.f32 %v117_v24, %v132_v38 }
 0x186   :  { %v136_v40 = vmul.f32 %v134_v39, %v134_v39 }
 0x188   :  { %v138_v41 = vsel %vm43_vm0, %v136_v40, 0.0 }
 0x189   :  { %139 = vadd.xlane.f32.xlu1 %v138_v41 }
 0x18f   :  { %v124_v42 = vpop.xlane.xlu0 %123 }
 0x190   :  { %v133_v43 = vmul.f32 %v131_v36, %v124_v42 }
 0x192   :  { %v135_v44 = vsub.f32 %v118_v28, %v133_v43 }
 0x194   :  { %v137_v45 = vmul.f32 %v135_v44, %v135_v44 }
 0x196   :  { %v141_v46 = vsel %vm43_vm0, %v137_v45, 0.0 }
 0x197   :  { %142 = vadd.xlane.f32.xlu1 %v141_v46 }
 0x1fc   :  { %v140_v51 = vpop.xlane.xlu1 %139 }
 0x1fd   :  { %v144_v52 = vmul.f32 %v140_v51, %v131_v36 }
 0x1ff   :  { %v146_v53 = vadd.f32 1e-06, %v144_v52 }
 0x201   :  { %264 = vrsqrt.f32 %v146_v53  ;;  %vm154_vm4 = vweird.f32 %v146_v53 }
 0x207   :  { %v265_v54 = vpop.eup %264 }
 0x208   :  { %v149_v55 = vmul.f32 %v265_v54, %v146_v53  ;;  %vm155_vm3 = vweird.f32 %v265_v54 }
 0x209   :  { %vm156_vm5 = vmor %vm154_vm4, %vm155_vm3 }
 0x20a   :  { %v150_v56 = vmul.f32 %v265_v54, %v149_v55  ;;  %v143_v57 = vpop.xlane.xlu1 %142 }
 0x20b   :  { %v145_v58 = vmul.f32 %v143_v57, %v131_v36 }
 0x20c   :  { %v151_v59 = vmul.f32 0.5, %v150_v56 }
 0x20d   :  { %v147_v60 = vadd.f32 1e-06, %v145_v58 }
 0x20e   :  { %v152_v61 = vsub.f32 1.5, %v151_v59 }
 0x20f   :  { %266 = vrsqrt.f32 %v147_v60  ;;  %vm164_vm7 = vweird.f32 %v147_v60 }
 0x210   :  { %v153_v62 = vmul.f32 %v265_v54, %v152_v61 }
 0x212   :  { %v157_v0 = vsel %vm156_vm5, %v265_v54, %v153_v62 }
 0x213   :  { %v168_v1 = vmul.f32 %v157_v0, %v134_v39 }
 0x215   :  { %v267_v3 = vpop.eup %266  ;;  %v174_v4 = vmul.f32 %v259_v63, %v168_v1 }
 0x216   :  { %v159_v5 = vmul.f32 %v267_v3, %v147_v60  ;;  %vm165_vm6 = vweird.f32 %v267_v3 }
 0x217   :  { %v180_v6 = vadd.f32 %v260_v2, %v174_v4  ;;  %vm166_vm8 = vmor %vm164_vm7, %vm165_vm6 }
 0x218   :  { %v160_v7 = vmul.f32 %v267_v3, %v159_v5 }
 0x219   :  { %243 = vmatmul.msk.f32.vlgmr.msra.gmra.mxu2 %vm43_vm0, %v180_v6 }
 0x21a   :  { %v161_v8 = vmul.f32 0.5, %v160_v7 }
 0x21c   :  { %v162_v9 = vsub.f32 1.5, %v161_v8 }
 0x21e   :  { %v163_v10 = vmul.f32 %v267_v3, %v162_v9 }
 0x220   :  { %v167_v11 = vsel %vm166_vm8, %v267_v3, %v163_v10 }
 0x221   :  { %v169_v12 = vmul.f32 %v167_v11, %v135_v44 }
 0x223   :  { %v175_v13 = vmul.f32 %v259_v63, %v169_v12 }
 0x225   :  { %v181_v14 = vadd.f32 %v260_v2, %v175_v13 }
 0x227   :  { %244 = vmatmul.msk.f32.gmra.mxu2 %vm43_vm0, %v181_v14 }
 0x29c   :  { %v213_v16 = vpop.f32.mrf.mxu2 }
 0x29d   :  { %v214_v17 = vadd.f32 %v261_v15, %v213_v16 }
 0x29f   :  { %219 = vst.msk [vmem:[#allocation2] sm:$0xff] %vm43_vm0, %v214_v17 }
 0x2aa   :  { %v216_v18 = vpop.f32.mrf.mxu2 }
 0x2ab   :  { %v217_v19 = vadd.f32 %v261_v15, %v216_v18 }
 0x2ad   :  { %220 = vst.msk [vmem:[#allocation2 + $0x8] sm:$0xff] %vm43_vm0, %v217_v19 }
 0x2ae   :  { %233 = dma.vmem_to_hbm [thread:$0]  %s226_s1, 256, %s228_s29, [#allocation3], %s296_s30, %s296_s30, %s297_s10  }
 0x2af   :  { %292 = dma.done.wait [#allocation3], 256  }
 0x2b0   :  { %293 = vsyncadd [#allocation3], 4294967040 }
 0x2b1   :  { %238 = vsyncpa [#allocation3], 1 }

// kernel: tpu_custom_call.1
= control target key start
LH: loop header
LB: loop body
LE: loop exit
PB: predicated region body
PF: predicated region fallthrough
CT: control target
= control target key end

     0   :  { %vm43_vm0 = vcmask 261120   ;;  %s430_s0 = inlined_call_operand.vmem [shape: f32[16,32], index: 0, kind: input, shape index: {}]   ;;  %s431_s1 = inlined_call_operand.vmem [shape: f32[32,64], index: 1, kind: input, shape index: {}]   ;;  %s432_s2 = inlined_call_operand.vmem [shape: f32[1,64], index: 2, kind: input, shape index: {}]   ;;  %s433_s3 = inlined_call_operand.vmem [shape: f32[64,32], index: 3, kind: input, shape index: {}]   ;;  %s434_s4 = inlined_call_operand.vmem [shape: f32[1,32], index: 4, kind: input, shape index: {}]   ;;  %s435_s5 = inlined_call_operand.vmem [shape: f32[1,32], index: 5, kind: input, shape index: {}]   ;;  %s436_s6 = inlined_call_operand.vmem [shape: f32[1,32], index: 6, kind: input, shape index: {}]   ;;  %s437_s7 = inlined_call_operand.vmem [shape: f32[32,32], index: 7, kind: input, shape index: {}]   ;;  %s438_s8 = inlined_call_operand.vmem [shape: f32[1,32], index: 8, kind: input, shape index: {}]   ;;  %s439_s9 = inlined_call_operand.hbm [shape: f32[16,32], index: 9, kind: output, shape index: {}]  }
   0x1   :  { %v38_v0 = vld [vmem:[%s431_s1 + $0x18] sm:$0xff]  ;;  %v37_v1 = vld [vmem:[%s431_s1 + $0x10] sm:$0xff]  ;;  %v36_v2 = vld [vmem:[%s431_s1 + $0x8] sm:$0xff] }
   0x2   :  { %62 = vmatpush.msra.mxu0 %v38_v0  ;;  %v82_v3 = vld [vmem:[%s433_s3 + $0x38] sm:$0xff]  ;;  %v81_v4 = vld [vmem:[%s433_s3 + $0x30] sm:$0xff]  ;;  %v35_v5 = vld [vmem:[%s431_s1] sm:$0xff] }
   0x3   :  { %v33_v6 = vld [vmem:[%s430_s0] sm:$0xff]  ;;  %102 = vmatpush.msra.mxu1 %v82_v3  ;;  %v80_v7 = vld [vmem:[%s433_s3 + $0x28] sm:$0xff]  ;;  %245 = vmatpush.msra.mxu3 %v82_v3 }
   0x4   :  { %63 = vmatpush.msra.mxu0 %v37_v1 }
   0x5   :  { %103 = vmatpush.msra.mxu1 %v81_v4 }
   0x6   :  { %64 = vmatpush.msra.mxu0 %v36_v2 }
   0x7   :  { %14 = vsyncpa [#allocation3], 0  ;;  %v79_v8 = vld [vmem:[%s433_s3 + $0x20] sm:$0xff]  ;;  %246 = vmatpush.msra.mxu3 %v81_v4  ;;  %104 = vmatpush.msra.mxu1 %v80_v7  ;;  %v78_v9 = vld [vmem:[%s433_s3 + $0x18] sm:$0xff]  ;;  %vm87_vm1 = vcmask 523264   ;;  %v294_v30 = vmov 32.0  }
   0x8   :  { %65 = vmatpush.msra.mxu0 %v35_v5  ;;  %v34_v10 = vld [vmem:[%s430_s0 + $0x8] sm:$0xff]  ;;  %v77_v11 = vld [vmem:[%s433_s3 + $0x10] sm:$0xff]  ;;  %v75_v13 = vld [vmem:[%s433_s3] sm:$0xff]  ;;  %262 = vrcp.f32 %v294_v30  ;;  %s295_s26 = smov [#allocation2]   ;;  %s227_s29 = sshll.u32 %s439_s9, 4  ;;  %s228_s29 = int_to_ptr.hbm [resolvable:$true] %s227_s29 }
   0x9   :  { %239 = vmatmul.msk.f32.vlgmr.msra.gmra.mxu0 %vm43_vm0, %v33_v6  ;;  %247 = vmatpush.msra.mxu3 %v80_v7  ;;  %v76_v12 = vld [vmem:[%s433_s3 + $0x8] sm:$0xff]  ;;  %v257_v14 = vld [vmem:[%s432_s2] ss:$0 sm:$0xff]  ;;  %v185_v47 = vld [vmem:[%s437_s7 + $0x18] sm:$0xff]  ;;  %s225_s1 = sshll.u32 %s295_s26, 4  ;;  %s296_s30 = smov 128   ;;  %s226_s1 = int_to_ptr.vmem [resolvable:$true] %s225_s1 }
   0xa   :  { %105 = vmatpush.msra.mxu1 %v79_v8  ;;  %v258_v21 = vld [vmem:[%s434_s4] ss:$0 sm:$0xff]  ;;  %208 = vmatpush.msra.mxu2 %v185_v47  ;;  %v184_v48 = vld [vmem:[%s437_s7 + $0x10] sm:$0xff]  ;;  %v183_v49 = vld [vmem:[%s437_s7 + $0x8] sm:$0xff]  ;;  %s297_s10 = smov 8  }
   0xb   :  { %248 = vmatpush.msra.mxu3 %v79_v8  ;;  %v182_v50 = vld [vmem:[%s437_s7] sm:$0xff] }
   0xc   :  { %106 = vmatpush.msra.mxu1 %v78_v9  ;;  %209 = vmatpush.msra.mxu2 %v184_v48  ;;  %v259_v63 = vld [vmem:[%s435_s5] ss:$0 sm:$0xff] }
   0xd   :  { %249 = vmatpush.msra.mxu3 %v78_v9  ;;  %v260_v2 = vld [vmem:[%s436_s6] ss:$0 sm:$0xff] }
   0xe   :  { %107 = vmatpush.msra.mxu1 %v77_v11  ;;  %v263_v31 = vpop.eup %262  ;;  %210 = vmatpush.msra.mxu2 %v183_v49 }
   0xf   :  { %250 = vmatpush.msra.mxu3 %v77_v11  ;;  %v126_v32 = vmul.f32 32.0, %v263_v31  ;;  %vm130_vm2 = vweird.f32 %v263_v31 }
  0x10   :  { %108 = vmatpush.msra.mxu1 %v76_v12  ;;  %211 = vmatpush.msra.mxu2 %v182_v50 }
  0x11   :  { %240 = vmatmul.msk.f32.gmra.mxu0 %vm43_vm0, %v34_v10  ;;  %251 = vmatpush.msra.mxu3 %v76_v12  ;;  %v127_v33 = vsub.f32 1.0, %v126_v32 }
  0x12   :  { %109 = vmatpush.msra.mxu1 %v75_v13 }
  0x13   :  { %252 = vmatpush.msra.mxu3 %v75_v13  ;;  %v128_v34 = vmul.f32 %v263_v31, %v127_v33 }
  0x15   :  { %v129_v35 = vadd.f32 %v263_v31, %v128_v34 }
  0x17   :  { %v131_v36 = vsel %vm130_vm2, %v263_v31, %v129_v35 }
  0x86   :  { %v67_v15 = vpop.f32.mrf.mxu0 }
  0x87   :  { %v68_v16 = vadd.f32 %v257_v14, %v67_v15  ;;  %v261_v15 = vld [vmem:[%s438_s8] ss:$0 sm:$0xff] }
  0x89   :  { %v73_v17 = vmax.f32 %v68_v16, 0.0 }
  0x8b   :  { %241 = vmatmul.msk.f32.vlgmr.msra.gmra.mxu1 %vm87_vm1, %v73_v17 }
  0x8e   :  { %v70_v18 = vpop.f32.mrf.mxu0 }
  0x8f   :  { %v71_v19 = vadd.f32 %v257_v14, %v70_v18 }
  0x91   :  { %v74_v20 = vmax.f32 %v71_v19, 0.0 }
  0x93   :  { %242 = vmatmul.msk.f32.vlgmr.msra.gmra.mxu3 %vm87_vm1, %v74_v20 }
 0x108   :  { %v111_v22 = vpop.f32.mrf.mxu1 }
 0x109   :  { %v112_v23 = vadd.f32 %v258_v21, %v111_v22 }
 0x10b   :  { %v117_v24 = vadd.f32 %v112_v23, %v33_v6 }
 0x10d   :  { %v119_v25 = vsel %vm43_vm0, %v117_v24, 0.0 }
 0x10e   :  { %120 = vadd.xlane.f32.xlu0 %v119_v25 }
 0x116   :  { %v114_v26 = vpop.f32.mrf.mxu3 }
 0x117   :  { %v115_v27 = vadd.f32 %v258_v21, %v114_v26 }
 0x119   :  { %v118_v28 = vadd.f32 %v115_v27, %v34_v10 }
 0x11b   :  { %v122_v29 = vsel %vm43_vm0, %v118_v28, 0.0 }
 0x11c   :  { %123 = vadd.xlane.f32.xlu0 %v122_v29 }
 0x181   :  { %v121_v37 = vpop.xlane.xlu0 %120 }
 0x182   :  { %v132_v38 = vmul.f32 %v131_v36, %v121_v37 }
 0x184   :  { %v134_v39 = vsub.f32 %v117_v24, %v132_v38 }
 0x186   :  { %v136_v40 = vmul.f32 %v134_v39, %v134_v39 }
 0x188   :  { %v138_v41 = vsel %vm43_vm0, %v136_v40, 0.0 }
 0x189   :  { %139 = vadd.xlane.f32.xlu1 %v138_v41 }
 0x18f   :  { %v124_v42 = vpop.xlane.xlu0 %123 }
 0x190   :  { %v133_v43 = vmul.f32 %v131_v36, %v124_v42 }
 0x192   :  { %v135_v44 = vsub.f32 %v118_v28, %v133_v43 }
 0x194   :  { %v137_v45 = vmul.f32 %v135_v44, %v135_v44 }
 0x196   :  { %v141_v46 = vsel %vm43_vm0, %v137_v45, 0.0 }
 0x197   :  { %142 = vadd.xlane.f32.xlu1 %v141_v46 }
 0x1fc   :  { %v140_v51 = vpop.xlane.xlu1 %139 }
 0x1fd   :  { %v144_v52 = vmul.f32 %v140_v51, %v131_v36 }
 0x1ff   :  { %v146_v53 = vadd.f32 1e-06, %v144_v52 }
 0x201   :  { %264 = vrsqrt.f32 %v146_v53  ;;  %vm154_vm4 = vweird.f32 %v146_v53 }
 0x207   :  { %v265_v54 = vpop.eup %264 }
 0x208   :  { %v149_v55 = vmul.f32 %v265_v54, %v146_v53  ;;  %vm155_vm3 = vweird.f32 %v265_v54 }
 0x209   :  { %vm156_vm5 = vmor %vm154_vm4, %vm155_vm3 }
 0x20a   :  { %v150_v56 = vmul.f32 %v265_v54, %v149_v55  ;;  %v143_v57 = vpop.xlane.xlu1 %142 }
 0x20b   :  { %v145_v58 = vmul.f32 %v143_v57, %v131_v36 }
 0x20c   :  { %v151_v59 = vmul.f32 0.5, %v150_v56 }
 0x20d   :  { %v147_v60 = vadd.f32 1e-06, %v145_v58 }
 0x20e   :  { %v152_v61 = vsub.f32 1.5, %v151_v59 }
 0x20f   :  { %266 = vrsqrt.f32 %v147_v60  ;;  %vm164_vm7 = vweird.f32 %v147_v60 }
 0x210   :  { %v153_v62 = vmul.f32 %v265_v54, %v152_v61 }
 0x212   :  { %v157_v0 = vsel %vm156_vm5, %v265_v54, %v153_v62 }
 0x213   :  { %v168_v1 = vmul.f32 %v157_v0, %v134_v39 }
 0x215   :  { %v267_v3 = vpop.eup %266  ;;  %v174_v4 = vmul.f32 %v259_v63, %v168_v1 }
 0x216   :  { %v159_v5 = vmul.f32 %v267_v3, %v147_v60  ;;  %vm165_vm6 = vweird.f32 %v267_v3 }
 0x217   :  { %v180_v6 = vadd.f32 %v260_v2, %v174_v4  ;;  %vm166_vm8 = vmor %vm164_vm7, %vm165_vm6 }
 0x218   :  { %v160_v7 = vmul.f32 %v267_v3, %v159_v5 }
 0x219   :  { %243 = vmatmul.msk.f32.vlgmr.msra.gmra.mxu2 %vm43_vm0, %v180_v6 }
 0x21a   :  { %v161_v8 = vmul.f32 0.5, %v160_v7 }
 0x21c   :  { %v162_v9 = vsub.f32 1.5, %v161_v8 }
 0x21e   :  { %v163_v10 = vmul.f32 %v267_v3, %v162_v9 }
 0x220   :  { %v167_v11 = vsel %vm166_vm8, %v267_v3, %v163_v10 }
 0x221   :  { %v169_v12 = vmul.f32 %v167_v11, %v135_v44 }
 0x223   :  { %v175_v13 = vmul.f32 %v259_v63, %v169_v12 }
 0x225   :  { %v181_v14 = vadd.f32 %v260_v2, %v175_v13 }
 0x227   :  { %244 = vmatmul.msk.f32.gmra.mxu2 %vm43_vm0, %v181_v14 }
 0x29c   :  { %v213_v16 = vpop.f32.mrf.mxu2 }
 0x29d   :  { %v214_v17 = vadd.f32 %v261_v15, %v213_v16 }
 0x29f   :  { %219 = vst.msk [vmem:[#allocation2] sm:$0xff] %vm43_vm0, %v214_v17 }
 0x2aa   :  { %v216_v18 = vpop.f32.mrf.mxu2 }
 0x2ab   :  { %v217_v19 = vadd.f32 %v261_v15, %v216_v18 }
 0x2ad   :  { %220 = vst.msk [vmem:[#allocation2 + $0x8] sm:$0xff] %vm43_vm0, %v217_v19 }
 0x2ae   :  { %233 = dma.vmem_to_hbm [thread:$0]  %s226_s1, 256, %s228_s29, [#allocation3], %s296_s30, %s296_s30, %s297_s10  }
 0x2af   :  { %292 = dma.done.wait [#allocation3], 256  }
 0x2b0   :  { %293 = vsyncadd [#allocation3], 4294967040 }
 0x2b1   :  { %238 = vsyncpa [#allocation3], 1 }

</bundles_post_ra>
